<compile_context>
chip_gen: v6e
topology: v6e:2x2x1
jax: 0.10.0
libtpu: 0.0.40
codegen_flags: <defaults>
</compile_context>

<pallas_src>
import functools
import math

import jax
import jax.numpy as jnp
from jax.experimental import pallas as pl
from jax.experimental.pallas import tpu as pltpu


def _conv1d_circ_relu_kernel(x_ref, w_ref, o_ref, *, K, pad, L, C_in, KC_pad):
    """One grid step: ReLU(W_im2col @ im2col(x)) on a lane-flat batch tile.

    x_ref: (C_in, T)       T = bb*L, lane p = b*L + l (batch-major); circular
                           indexing is per length-L segment.
    w_ref: (C_out, KC_pad) im2col-flattened weights, zero-padded contraction.
    o_ref: (C_out, T)      lane-dense output slab (same flat layout as x).
    """
    T = x_ref.shape[-1]
    x = x_ref[...]

    need_mask = any((pad - k) % L != 0 for k in range(K))
    if need_mask:
        # Lane position within its own length-L segment (used to fix the
        # cross-segment wrap of the flat roll). Built once, reused per tap.
        lane_in_seg = jax.lax.broadcasted_iota(jnp.int32, (C_in, T), 1) % L

    taps = []
    for k in range(K):
        s = (pad - k) % L                          # per-tap circular shift
        if s == 0:
            taps.append(x)
        else:
            # XLU rolls (otherwise-idle unit) instead of slice+concat copies.
            r_main = pltpu.roll(x, s, axis=1)            # x[(p - s)     mod T]
            r_wrap = pltpu.roll(x, (s - L) % T, axis=1)  # x[(p - s + L) mod T]
            # Lanes with l < s must wrap inside their OWN length-L segment,
            # not into the previous batch element -> take the (s - L) roll.
            taps.append(jnp.where(lane_in_seg < s, r_wrap, r_main))
    if KC_pad > K * C_in:                          # zero rows: aligned contraction
        taps.append(jnp.zeros((KC_pad - K * C_in, T), x.dtype))
    x_col = jnp.concatenate(taps, axis=0)          # (KC_pad, T)

    # ONE MXU matmul per grid step, f32 accumulation, one dense store.
    y = jnp.dot(w_ref[...], x_col, preferred_element_type=jnp.float32)
    o_ref[...] = jnp.maximum(y, 0.0).astype(o_ref.dtype)


def _pick_batch_block(N, C_in, C_out, KC_pad, L, budget_bytes=10 << 20):
    """Pick the per-grid-step batch tile `bb`.

    Goals: (a) lane-dense blocks -- bb*L a multiple of 128 so every DMA/store
    is an unmasked full-lane access; (b) as few grid steps as possible (each
    costs ~0.35us) while the double-buffered f32 working set stays well under
    every generation's scoped VMEM (v5e 16 MiB default, v7x 64 MiB physical).
    """
    lane_q = 128 // math.gcd(L, 128)          # smallest bb with (bb*L) % 128 == 0
    # Rough f32 bytes per batch element: double-buffered in/out blocks plus the
    # in-kernel im2col / roll temporaries.
    bytes_per_b = 4 * L * (4 * C_in + 3 * C_out + 2 * KC_pad)
    bb_cap = max(1, budget_bytes // max(bytes_per_b, 1))
    if N <= bb_cap:
        bb = -(-N // lane_q) * lane_q         # whole batch, rounded up for dense lanes
        if bb > bb_cap:                       # rounding overshot the budget:
            bb = N                            # a full-extent block is still legal
        return max(1, bb)
    bb = (bb_cap // lane_q) * lane_q          # multi-step: keep 128-lane alignment
    return max(bb, lane_q)


def basic_block_forward(x_ncl, weight, *, batch_block=None):
    """ReLU(Conv1d(x, weight, bias=None, padding=K//2, padding_mode='circular')).

    x_ncl:  (N, C_in, L)   float32, PyTorch NCL layout
    weight: (C_out, C_in, K) float32, PyTorch Conv1d weight layout
    returns (N, C_out, L_out); L_out = L for odd K, L + 1 for even K (PyTorch's
    output-length formula with circular padding).
    """
    N, C_in, L = x_ncl.shape
    C_out, C_in_w, K = weight.shape
    assert C_in_w == C_in
    pad = K // 2
    KC = K * C_in
    KC_pad = -(-KC // 8) * 8                  # pad contraction dim to sublane multiple

    x_ncl = x_ncl.astype(jnp.float32)
    # im2col weight: w_flat[co, k*C_in + ci] = weight[co, ci, k]; zero-pad columns.
    w_flat = jnp.transpose(weight.astype(jnp.float32), (0, 2, 1)).reshape(C_out, KC)
    w_flat = jnp.pad(w_flat, ((0, 0), (0, KC_pad - KC)))

    lane_q = 128 // math.gcd(L, 128)
    if batch_block is None:
        bb = _pick_batch_block(N, C_in, C_out, KC_pad, L)
    else:
        bb = max(1, int(batch_block))
        bb = -(-bb // lane_q) * lane_q        # keep every block 128-lane aligned
    nb = pl.cdiv(N, bb)
    n_pad = nb * bb

    xp = x_ncl if n_pad == N else jnp.pad(x_ncl, ((0, n_pad - N), (0, 0), (0, 0)))
    # Lane-flat NCL: x_flat[ci, b*L + l] = x[b, ci, l]. One XLA-side transpose;
    # every in-kernel load/store is then dense on the 128-lane axis.
    x_flat = jnp.transpose(xp, (1, 0, 2)).reshape(C_in, n_pad * L)

    T = bb * L
    kernel = functools.partial(_conv1d_circ_relu_kernel, K=K, pad=pad, L=L,
                               C_in=C_in, KC_pad=KC_pad)

    cost = pl.CostEstimate(
        flops=2 * n_pad * C_out * KC * L,
        transcendentals=0,
        bytes_accessed=4 * (C_in * n_pad * L + C_out * KC_pad + C_out * n_pad * L),
    )

    out_flat = pl.pallas_call(
        kernel,
        out_shape=jax.ShapeDtypeStruct((C_out, n_pad * L), jnp.float32),
        grid_spec=pltpu.PrefetchScalarGridSpec(
            num_scalar_prefetch=0,
            grid=(nb,),
            in_specs=[
                pl.BlockSpec((C_in, T), lambda i: (0, i)),
                pl.BlockSpec((C_out, KC_pad), lambda i: (0, 0)),
            ],
            out_specs=pl.BlockSpec((C_out, T), lambda i: (0, i)),
        ),
        compiler_params=pltpu.CompilerParams(
            dimension_semantics=("parallel",),
            vmem_limit_bytes=32 * 1024 * 1024),
        cost_estimate=cost,
    )(x_flat, w_flat)

    out = out_flat.reshape(C_out, n_pad, L)[:, :N]
    out = jnp.transpose(out, (1, 0, 2))       # (N, C_out, L), PyTorch NCL
    if K % 2 == 0:
        # Even K: PyTorch's circular conv yields L+1 columns; the trailing
        # column equals column 0 (also after ReLU).
        out = jnp.concatenate([out, out[..., :1]], axis=-1)
    return out


def _reference(x_ncl, weight):
    """Pure-JAX reference: circular pad + Conv1d + ReLU (matches PyTorch)."""
    N, C_in, L = x_ncl.shape
    C_out, _, K = weight.shape
    pad = K // 2
    idx = (jnp.arange(L + 2 * pad) - pad) % L
    x_pad = x_ncl[:, :, idx]                              # (N, C_in, L + 2*pad)
    L_out = L + 2 * pad - K + 1
    out = jnp.zeros((N, C_out, L_out), jnp.float32)
    for k in range(K):
        out = out + jnp.einsum('oc,ncl->nol', weight[:, :, k],
                               x_pad[:, :, k:k + L_out])
    return jnp.maximum(out, 0.0)


if __name__ == "__main__":
    key = jax.random.PRNGKey(0)
    ks = jax.random.split(key, 8)

    # Test 1: shapes matching the module's KdV-style usage (NCL input), odd K.
    N, C_in, C_out, L, K = 2, 4, 8, 16, 3
    x = jax.random.normal(ks[0], (N, C_in, L), dtype=jnp.float32)
    bound = 1.0 / (C_in * K) ** 0.5
    w = jax.random.uniform(ks[1], (C_out, C_in, K), minval=-bound, maxval=bound,
                           dtype=jnp.float32)
    out = jax.block_until_ready(basic_block_forward(x, w))
    assert out.shape == (N, C_out, L)
    assert jnp.allclose(out, _reference(x, w), atol=1e-5, rtol=1e-5)

    # Test 2: K=5, batch padded up for lane density (N=3 -> 4), one grid step.
    N2, Ci2, Co2, L2, K2 = 3, 2, 16, 32, 5
    x2 = jax.random.normal(ks[2], (N2, Ci2, L2), dtype=jnp.float32)
    w2 = 0.1 * jax.random.normal(ks[3], (Co2, Ci2, K2), dtype=jnp.float32)
    out2 = jax.block_until_ready(basic_block_forward(x2, w2))
    assert out2.shape == (N2, Co2, L2)
    assert jnp.allclose(out2, _reference(x2, w2), atol=1e-5, rtol=1e-5)

    # Test 3: explicit batch_block -> multi-step grid (nb=4), L already 128.
    N3, Ci3, Co3, L3, K3 = 8, 3, 8, 128, 5
    x3 = jax.random.normal(ks[4], (N3, Ci3, L3), dtype=jnp.float32)
    w3 = 0.1 * jax.random.normal(ks[5], (Co3, Ci3, K3), dtype=jnp.float32)
    out3 = jax.block_until_ready(basic_block_forward(x3, w3, batch_block=2))
    assert out3.shape == (N3, Co3, L3)
    assert jnp.allclose(out3, _reference(x3, w3), atol=1e-5, rtol=1e-5)

    # Test 4: even kernel size (PyTorch circular conv emits L+1 columns).
    N4, Ci4, Co4, L4, K4 = 2, 2, 4, 16, 4
    x4 = jax.random.normal(ks[6], (N4, Ci4, L4), dtype=jnp.float32)
    w4 = 0.2 * jax.random.normal(ks[7], (Co4, Ci4, K4), dtype=jnp.float32)
    out4 = jax.block_until_ready(basic_block_forward(x4, w4))
    assert out4.shape == (N4, Co4, L4 + 1)
    assert jnp.allclose(out4, _reference(x4, w4), atol=1e-5, rtol=1e-5)

    print("KERNEL_OK")
</pallas_src>

<mosaic_0001>
module attributes {stable_mosaic.version = 11 : i64} {
  func.func @_conv1d_circ_relu_kernel(%arg0: i32, %arg1: memref<4x128xf32, #tpu.memory_space<vmem>>, %arg2: memref<8x16xf32, #tpu.memory_space<vmem>>, %arg3: memref<8x128xf32, #tpu.memory_space<vmem>>) attributes {dimension_semantics = [#tpu.dimension_semantics<parallel>], iteration_bounds = array<i64: 1>, scalar_prefetch = 0 : i64, scratch_operands = 0 : i64, tpu.core_type = #tpu.core_type<tc>, window_params = [{transform_indices = @transform_0, window_bounds = array<i64: 4, 128>}, {pipeline_mode = #tpu.pipeline_mode<synchronous>, transform_indices = @transform_1, window_bounds = array<i64: 8, 16>}, {transform_indices = @transform_2, window_bounds = array<i64: 8, 128>}]} {
    %c0 = arith.constant 0 : index
    %c0_0 = arith.constant 0 : index
    %0 = vector.load %arg1[%c0, %c0_0] : memref<4x128xf32, #tpu.memory_space<vmem>>, vector<4x128xf32>
    %1 = tpu.iota {dimensions = array<i32: 1>} : vector<4x128xi32>
    %c16_i32 = arith.constant 16 : i32
    %c0_i32 = arith.constant 0 : i32
    %2 = arith.cmpi eq, %c16_i32, %c0_i32 : i32
    %c1_i32 = arith.constant 1 : i32
    %3 = arith.select %2, %c1_i32, %c16_i32 : i32
    %4 = vector.broadcast %3 : i32 to vector<4x128xi32>
    %5 = arith.remsi %1, %4 : vector<4x128xi32>
    %c0_i32_1 = arith.constant 0 : i32
    %6 = vector.broadcast %c0_i32_1 : i32 to vector<4x128xi32>
    %7 = arith.cmpi ne, %5, %6 : vector<4x128xi32>
    %c0_i32_2 = arith.constant 0 : i32
    %8 = vector.broadcast %c0_i32_2 : i32 to vector<4x128xi32>
    %9 = arith.cmpi slt, %5, %8 : vector<4x128xi32>
    %c0_i32_3 = arith.constant 0 : i32
    %10 = arith.cmpi slt, %3, %c0_i32_3 : i32
    %11 = vector.broadcast %10 : i1 to vector<4x128xi1>
    %12 = vector.broadcast %11 : vector<4x128xi1> to vector<4x128xi1>
    %13 = arith.xori %9, %12 : vector<4x128xi1>
    %14 = arith.andi %13, %7 : vector<4x128xi1>
    %15 = vector.broadcast %3 : i32 to vector<4x128xi32>
    %16 = arith.addi %5, %15 : vector<4x128xi32>
    %17 = arith.select %14, %16, %5 : vector<4x128xi1>, vector<4x128xi32>
    %c1_i32_4 = arith.constant 1 : i32
    %18 = tpu.dynamic_rotate %0 by %c1_i32_4 dim 1 : vector<4x128xf32>, i32 -> vector<4x128xf32>
    %c113_i32 = arith.constant 113 : i32
    %19 = tpu.dynamic_rotate %0 by %c113_i32 dim 1 : vector<4x128xf32>, i32 -> vector<4x128xf32>
    %c1_i32_5 = arith.constant 1 : i32
    %20 = vector.broadcast %c1_i32_5 : i32 to vector<4x128xi32>
    %21 = arith.cmpi slt, %17, %20 : vector<4x128xi32>
    %22 = arith.select %21, %19, %18 : vector<4x128xi1>, vector<4x128xf32>
    %c15_i32 = arith.constant 15 : i32
    %23 = tpu.dynamic_rotate %0 by %c15_i32 dim 1 : vector<4x128xf32>, i32 -> vector<4x128xf32>
    %c127_i32 = arith.constant 127 : i32
    %24 = tpu.dynamic_rotate %0 by %c127_i32 dim 1 : vector<4x128xf32>, i32 -> vector<4x128xf32>
    %c15_i32_6 = arith.constant 15 : i32
    %25 = vector.broadcast %c15_i32_6 : i32 to vector<4x128xi32>
    %26 = arith.cmpi slt, %17, %25 : vector<4x128xi32>
    %27 = arith.select %26, %24, %23 : vector<4x128xi1>, vector<4x128xf32>
    %cst = arith.constant 0.000000e+00 : f32
    %28 = vector.broadcast %cst : f32 to vector<4x128xf32>
    %29 = tpu.concatenate %22, %0, %27, %28 in 0 : vector<4x128xf32>, vector<4x128xf32>, vector<4x128xf32>, vector<4x128xf32> -> vector<16x128xf32>
    %c0_7 = arith.constant 0 : index
    %c0_8 = arith.constant 0 : index
    %30 = vector.load %arg2[%c0_7, %c0_8] : memref<8x16xf32, #tpu.memory_space<vmem>>, vector<8x16xf32>
    %cst_9 = arith.constant dense<0.000000e+00> : vector<8x128xf32>
    %31 = tpu.matmul %30, %29, %cst_9 {dimension_numbers = #tpu.dot_dimension_numbers<[1], [0], [0], [1], [0, 0, 1, 1], [], []>} : vector<8x16xf32>, vector<16x128xf32>, vector<8x128xf32> -> vector<8x128xf32>
    %cst_10 = arith.constant 0.000000e+00 : f32
    %32 = vector.broadcast %cst_10 : f32 to vector<8x128xf32>
    %33 = arith.maximumf %31, %32 : vector<8x128xf32>
    %c0_11 = arith.constant 0 : index
    %c0_12 = arith.constant 0 : index
    %34 = vector.load %arg3[%c0_11, %c0_12] : memref<8x128xf32, #tpu.memory_space<vmem>>, vector<8x128xf32>
    tpu.vector_store %arg3[%c0_11, %c0_12], %33 {strides = array<i32>} : memref<8x128xf32, #tpu.memory_space<vmem>>, vector<8x128xf32>,
    return
  }
  func.func @transform_0(%arg0: i32) -> (i32, i32) {
    %c0_i32 = arith.constant 0 : i32
    %c0_i32_0 = arith.constant 0 : i32
    return %c0_i32, %arg0 : i32, i32
  }
  func.func @transform_1(%arg0: i32) -> (i32, i32) {
    %c0_i32 = arith.constant 0 : i32
    %c0_i32_0 = arith.constant 0 : i32
    %c0_i32_1 = arith.constant 0 : i32
    return %c0_i32, %c0_i32_0 : i32, i32
  }
  func.func @transform_2(%arg0: i32) -> (i32, i32) {
    %c0_i32 = arith.constant 0 : i32
    %c0_i32_0 = arith.constant 0 : i32
    return %c0_i32, %arg0 : i32, i32
  }
}

</mosaic_0001>

<bundles_post_ra>
// kernel: tpu_custom_call.1
= control target key start
LH: loop header
LB: loop body
LE: loop exit
PB: predicated region body
PF: predicated region fallthrough
CT: control target
= control target key end

     0   :  { %7 = vsyncpa [#allocation3], 0  ;;  %s282_s0 = inlined_call_operand.hbm [shape: f32[4,128], index: 0, kind: input, shape index: {}]   ;;  %s283_s1 = inlined_call_operand.hbm [shape: f32[8,16], index: 1, kind: input, shape index: {}]   ;;  %s284_s2 = inlined_call_operand.hbm [shape: f32[8,128], index: 2, kind: output, shape index: {}]  }
   0x1   :  { %8 = vsyncpa [#allocation6], 0 }
   0x2   :  { %9 = vsyncpa [#allocation4], 0  ;;  %s249_s9 = smov [#allocation2]   ;;  %s250_s11 = smov [#allocation5]  }
   0x3   :  { %s16_s10 = sshll.u32 %s249_s9, 4  ;;  %s26_s12 = sshll.u32 %s250_s11, 4  ;;  %s17_s10 = int_to_ptr.vmem [resolvable:$true] %s16_s10  ;;  %s27_s12 = int_to_ptr.vmem [resolvable:$true] %s26_s12 }
   0x4   :  { %s191_s13 = scalar_lea.vmem %s17_s10, 64  ;;  %p196_p1 = scmp.lt.s32.totalorder %s17_s10, %s17_s10 }
   0x5   :  { %p192_p0 = scmp.ne.s32.totalorder %s17_s10, %s191_s13  ;;  %p197_p2 = scmp.lt.s32.totalorder %s191_s13, %s191_s13 }
   0x7   :  { %p198_p3 = por %p197_p2, %p196_p1 }
   0x9   :  { %p199_p4 = pnand %p198_p3, %p192_p0 }
   0xb   :  { %202 = shalt.err (!%p199_p4)
}
   0xc   :  { %19 = dma.hbm_to_vmem [thread:$0]  %s282_s0, 64, %s17_s10, [#allocation3]  }
   0xd   :  { %s211_s16 = scalar_lea.vmem %s27_s12, 128  ;;  %p216_p6 = scmp.lt.s32.totalorder %s27_s12, %s27_s12 }
   0xe   :  { %p212_p5 = scmp.ne.s32.totalorder %s27_s12, %s211_s16  ;;  %p217_p7 = scmp.lt.s32.totalorder %s211_s16, %s211_s16 }
  0x10   :  { %p218_p8 = por %p217_p7, %p216_p6 }
  0x12   :  { %p219_p9 = pnand %p218_p8, %p212_p5 }
  0x14   :  { %222 = shalt.err (!%p219_p9)
}
  0x15   :  { %29 = dma.hbm_to_vmem [thread:$0]  %s283_s1, 128, %s27_s12, [#allocation6]  }
  0x16   :  { %243 = dma.done.wait [#allocation3], 64  }
  0x17   :  { %244 = vsyncadd [#allocation3], 4294967232 }
  0x18   :  { %245 = dma.done.wait [#allocation6], 128  }
  0x19   :  { %246 = vsyncadd [#allocation6], 4294967168  ;;  %v251_v0 = vmov 0.0   ;;  %vm252_vm0 = vmmov 0   ;;  %v36_v1 = vld [vmem:[#allocation2] sm:$0xf]  ;;  %v37_v2 = vlaneseq }
  0x1a   :  { %167 = vmatprep.subr.mxu0 %v251_v0  ;;  %171 = vmatprep.mubr.msk.f32.mxu0 %vm252_vm0, %v251_v0  ;;  %s253_s0 = smov 1   ;;  %s254_s19 = smov 15   ;;  %v64_v7 = vrot.slane %v36_v1, 4  ;;  %vm66_vm3 = vcmask 1043456   ;;  %v69_v13 = vld [vmem:[#allocation5] sm:$0xff]  ;;  %vm70_vm4 = vcmask 130048  }
  0x1b   :  { %51 = vrot.lane.b32.xlu1 %v36_v1, %s253_s0  ;;  %57 = vrot.lane.b32.xlu0 %v36_v1, %s254_s19  ;;  %s255_s20 = smov 113   ;;  %s256_s21 = smov 127   ;;  %v38_v3 = vand.u32 127, %v37_v2 }
  0x1c   :  { %s257_s1 = smov [#allocation7]  }
  0x1d   :  { %v43_v4 = vand.u32 15, %v38_v3  ;;  %s152_s22 = sshll.u32 %s257_s1, 4  ;;  %s153_s22 = int_to_ptr.vmem [resolvable:$true] %s152_s22 }
  0x1e   :  { %s223_s23 = scalar_lea.vmem %s153_s22, 128  ;;  %p228_p11 = scmp.lt.s32.totalorder %s153_s22, %s153_s22 }
  0x1f   :  { %53 = vrot.lane.b32.xlu1 %v36_v1, %s255_s20  ;;  %59 = vrot.lane.b32.xlu0 %v36_v1, %s256_s21  ;;  %vm55_vm1 = vcmp.lt.s32.totalorder %v43_v4, 1  ;;  %vm61_vm2 = vcmp.lt.s32.totalorder %v43_v4, 15  ;;  %p224_p10 = scmp.ne.s32.totalorder %s153_s22, %s223_s23  ;;  %p229_p12 = scmp.lt.s32.totalorder %s223_s23, %s223_s23 }
  0x21   :  { %p230_p13 = por %p229_p12, %p228_p11 }
  0x23   :  { %p231_p0 = pnand %p230_p13, %p224_p10 }
  0x8d   :  { %v52_v5 = vpop.permute.xlu1 %51  ;;  %v58_v6 = vpop.permute.xlu0 %57 }
  0x91   :  { %v54_v8 = vpop.permute.xlu1 %53  ;;  %v60_v9 = vpop.permute.xlu0 %59 }
  0x92   :  { %v56_v10 = vsel %vm55_vm1, %v54_v8, %v52_v5  ;;  %v62_v11 = vsel %vm61_vm2, %v60_v9, %v58_v6 }
  0x93   :  { %168 = vmatpush3.msk.msra.mxu0 %vm66_vm3, %v62_v11  ;;  %v67_v12 = vsel %vm66_vm3, %v56_v10, %v64_v7 }
  0x94   :  { %169 = vmatprep.subr.mxu0 %v251_v0 }
  0x95   :  { %170 = vmatpush3.msra.mxu0 %v67_v12 }
  0x96   :  { %172 = vmatmul.mubr.msk.f32.vlgmr.msra.gmra.mxu0 %vm70_vm4, %v69_v13 }
 0x156   :  { %v140_v14 = vpop.f32.mrf.mxu0 }
 0x157   :  { %v144_v15 = vmax.f32 %v140_v14, 0.0 }
 0x158   :  { %v173_v16 = vpop.f32.mrf.mxu0 }
 0x159   :  { %145 = vst [vmem:[#allocation7] sm:$0xff] %v144_v15 }
 0x15a   :  { %234 = shalt.err (!%p231_p0)
}
 0x15b   :  { %155 = dma.vmem_to_hbm [thread:$0]  %s153_s22, 128, %s284_s2, [#allocation4]  }
 0x15c   :  { %247 = dma.done.wait [#allocation4], 128  }
 0x15d   :  { %248 = vsyncadd [#allocation4], 4294967168 }
 0x15e   :  { %159 = vsyncpa [#allocation3], 1 }
 0x15f   :  { %160 = vsyncpa [#allocation6], 1 }
 0x160   :  { %161 = vsyncpa [#allocation4], 1 }

</bundles_post_ra>
